<compile_context>
chip_gen: v7x
topology: tpu7x:2x2x1
jax: 0.10.0
libtpu: 0.0.40
codegen_flags: <defaults>
</compile_context>

<pallas_src>
import functools

import numpy as np
import jax
import jax.numpy as jnp
from jax.experimental import pallas as pl
from jax.experimental.pallas import tpu as pltpu


def _basenet_forward_kernel(x_ref, o_ref):
    # Identity forward (abstract BaseNet defines no computation).
    o_ref[...] = x_ref[...]


def _vmem_capacity_bytes(default: int = 64 << 20) -> int:
    """Physical VMEM per core; conservative (v7x-sized) fallback if unknown."""
    try:
        return int(pltpu.get_tpu_info().vmem_capacity_bytes)
    except Exception:
        return default


def _sublane_multiple(itemsize: int) -> int:
    """Row granularity: 8 for 32-bit, 16 for 16-bit, 32 for 8-bit dtypes."""
    return 8 * max(1, 4 // max(1, itemsize))


def _choose_lanes(total: int, sub: int, max_lanes: int = 4096):
    """Largest 128-multiple lane width that divides `total`, preferring one
    that still leaves >= 2*sub rows so the grid can pipeline / shard."""
    best = None
    for k in range(max_lanes // 128, 0, -1):
        lanes = 128 * k
        if total % lanes:
            continue
        if best is None:
            best = lanes                     # largest divisor overall
        if total // lanes >= 2 * sub:
            return lanes                     # largest divisor with >=2 row tiles
    return best


def _pick_row_tile(rows: int, row_bytes: int, sub: int,
                   target_tile_bytes: int) -> int:
    """Row tile: multiple of `sub`, ~target_tile_bytes, and (when possible)
    at most half the rows so the grid has >= 2 steps."""
    if rows < sub:
        return rows                          # full-extent block is always legal
    budget = max(sub, (target_tile_bytes // max(row_bytes, 1)) // sub * sub)
    tile = min(rows, budget)
    if rows >= 2 * sub:
        half = -(-rows // 2)                 # ceil(rows / 2)
        half = -(-half // sub) * sub         # round up to sublane multiple
        tile = min(tile, half)
    return max(sub, (tile // sub) * sub)


@functools.partial(jax.jit, donate_argnums=(0,))
def _basenet_forward_pallas(x_nchw: jax.Array) -> jax.Array:
    """Pallas streaming-copy template (in-place, aliased, lane-dense)."""
    shape = x_nchw.shape
    total = int(np.prod(shape))
    itemsize = x_nchw.dtype.itemsize
    sub = _sublane_multiple(itemsize)

    lanes = _choose_lanes(total, sub)
    if lanes is not None:
        rows, cols = total // lanes, lanes    # lane-dense: cols % 128 == 0
    else:
        # TODO(synk): element count not a multiple of 128 -> fall back to
        # (leading, last-two) layout with masked partial stores; pad to a
        # 128-multiple lane width if this path ever matters for perf.
        cols = shape[-1] * shape[-2] if len(shape) >= 2 else total
        rows = total // cols
    x2d = x_nchw.reshape(rows, cols)

    cap = _vmem_capacity_bytes()
    target_tile_bytes = min(8 << 20, cap // 16)   # ~4 MiB v7x, ~8 MiB v5e/v6e
    tile_r = _pick_row_tile(rows, cols * itemsize, sub, target_tile_bytes)
    tile_bytes = tile_r * cols * itemsize
    # 2 double-buffered copies each for input and (aliased) output + headroom.
    vmem_limit = int(min(cap * 3 // 4, max(32 << 20, 6 * tile_bytes)))

    grid = (pl.cdiv(rows, tile_r),)               # cdiv: no exact-divisor need

    out2d = pl.pallas_call(
        _basenet_forward_kernel,
        out_shape=jax.ShapeDtypeStruct((rows, cols), x2d.dtype),
        grid=grid,
        in_specs=[pl.BlockSpec((tile_r, cols), lambda i: (i, 0))],
        out_specs=pl.BlockSpec((tile_r, cols), lambda i: (i, 0)),
        input_output_aliases={0: 0},              # in-place on the donated buffer
        compiler_params=pltpu.CompilerParams(
            dimension_semantics=("parallel",),
            vmem_limit_bytes=vmem_limit,
        ),
    )(x2d)

    return out2d.reshape(shape)


def basenet_forward(x_nchw: jax.Array, *, materialize: bool = False) -> jax.Array:
    """Forward pass for BaseNet.

    BaseNet.forward is abstract, so the forward semantics is the identity.
    By default the identity is short-circuited (no kernel launch, zero HBM
    traffic).  `materialize=True` runs the Pallas streaming-copy template
    that a concrete subclass's compute would replace; it DONATES `x_nchw`
    (the caller must not reuse the input buffer afterwards).
    """
    if not materialize:
        return x_nchw
    return _basenet_forward_pallas(x_nchw)


if __name__ == "__main__":
    key = jax.random.PRNGKey(0)
    # Small NCHW input consistent with a generic forward(X) signature.
    x = jax.random.normal(key, (2, 4, 16, 16), dtype=jnp.float32)

    # Host-side reference copy (the device buffer of `x` is donated below).
    x_host = np.asarray(x)

    # Default path: abstract forward == identity, short-circuited (no launch).
    y_fast = basenet_forward(x)
    assert y_fast is x

    # Template path: run the Pallas kernel once (in-place, donates x).
    y = jax.block_until_ready(basenet_forward(x, materialize=True))

    assert y.shape == x_host.shape and y.dtype == jnp.float32
    assert np.allclose(np.asarray(y), x_host), "identity forward mismatch"

    print("KERNEL_OK")
</pallas_src>

<mosaic_0001>
module attributes {stable_mosaic.version = 11 : i64} {
  func.func @_basenet_forward_kernel(%arg0: i32, %arg1: memref<8x128xf32, #tpu.memory_space<vmem>>, %arg2: memref<8x128xf32, #tpu.memory_space<vmem>>) attributes {dimension_semantics = [#tpu.dimension_semantics<parallel>], iteration_bounds = array<i64: 2>, scalar_prefetch = 0 : i64, scratch_operands = 0 : i64, tpu.core_type = #tpu.core_type<tc>, window_params = [{transform_indices = @transform_0, window_bounds = array<i64: 8, 128>}, {transform_indices = @transform_1, window_bounds = array<i64: 8, 128>}]} {
    %c0 = arith.constant 0 : index
    %c0_0 = arith.constant 0 : index
    %0 = vector.load %arg1[%c0, %c0_0] : memref<8x128xf32, #tpu.memory_space<vmem>>, vector<8x128xf32>
    %c0_1 = arith.constant 0 : index
    %c0_2 = arith.constant 0 : index
    %1 = vector.load %arg2[%c0_1, %c0_2] : memref<8x128xf32, #tpu.memory_space<vmem>>, vector<8x128xf32>
    tpu.vector_store %arg2[%c0_1, %c0_2], %0 {strides = array<i32>} : memref<8x128xf32, #tpu.memory_space<vmem>>, vector<8x128xf32>,
    return
  }
  func.func @transform_0(%arg0: i32) -> (i32, i32) {
    %c0_i32 = arith.constant 0 : i32
    %c0_i32_0 = arith.constant 0 : i32
    return %arg0, %c0_i32 : i32, i32
  }
  func.func @transform_1(%arg0: i32) -> (i32, i32) {
    %c0_i32 = arith.constant 0 : i32
    %c0_i32_0 = arith.constant 0 : i32
    return %arg0, %c0_i32 : i32, i32
  }
}

</mosaic_0001>

<bundles_post_ra>
// kernel: _basenet_forward_pallas.1
= control target key start
LH: loop header
LB: loop body
LE: loop exit
PB: predicated region body
PF: predicated region fallthrough
CT: control target
= control target key end

     0   :  { %s188_s6 = smov 0   ;;  %s208_s0 = inlined_call_operand.vmem [shape: f32[16,128], index: 0, kind: input, shape index: {}, may-alias: {0,1}]   ;;  %s209_s1 = inlined_call_operand.vmem [shape: f32[16,128], index: 1, kind: output, shape index: {}, may-alias: {0,1}]  }
   0x1 LB: > { %s167_s7 = sadd.s32 4294967295, %s190_s6   ;;  %p171_p0 = scmp.ge.s32.totalorder %s190_s6, 1  ;;  %s190_s6 = sphi %s188_s6, %s11_s6  }
   0x2   : > { %p86_p1 = scmp.lt.s32.totalorder %s190_s6, 3 }
   0x4   : > { %p87_p2 = pnand %p171_p0, %p86_p1 }
   0x5   : > { %p104_p3 = scmp.lt.s32.totalorder (!%p87_p2), %s167_s7, 1 }
   0x6   : > { %90 = sbr.rel (%p87_p2) target bundleno = 18 (0x12), region = 24 }
   0xd   : > { %s211_s7 = smov (!%p104_p3, %s167_s7), 1 }
   0xe   : > { %s172_s8 = sshll.u32 %s211_s7, 3 }
   0xf   : > { %s107_s11 = scalar_lea.vmem %s208_s0, %s172_s8  ;;  %s111_s14 = scalar_lea.vmem %s209_s1, %s172_s8 }
  0x10   : > { %v112_v0 = vld [vmem:[%s107_s11] sm:$0xff] }
  0x11   : > { %113 = vst [vmem:[%s111_s14] sm:$0xff] %v112_v0 }
  0x12 PF: > { %s11_s6 = sadd.s32 1, %s190_s6  }
  0x13   : > { %p8_p4 = scmp.ge.s32.totalorder %s11_s6, 4  }
  0x15   :  { %10 = sbr.rel (!%p8_p4) target bundleno = 1 (0x1), region = 54 }

</bundles_post_ra>
